<compile_context>
chip_gen: v6e
topology: v6e:2x2x1
jax: 0.10.0
libtpu: 0.0.40
codegen_flags: <defaults>
</compile_context>

<pallas_src>
import functools

import jax
import jax.numpy as jnp
from jax import lax
from jax.experimental import pallas as pl
from jax.experimental.pallas import tpu as pltpu


def _cdiv(a, b):
    return -(-a // b)


def _round_up(a, m):
    return _cdiv(a, m) * m


# ---------------------------------------------------------------------------
# Pallas kernel: one (batch, lane-tile) step.
#   x_ref     : (C_in, W2)        f32   padded input window for this tile
#   w_ref     : (C_out, C_in*K)   bf16  conv weight, [k*C_in + c] order,
#                                       conv_scale already folded in
#   b_ref     : (C_out, 1)        f32   per-channel bias
#   o_ref     : (C_out, TL)       f32   output tile (NCL layout, lane-dense)
#   patch_ref : (C_in*K, TL)      f32   VMEM scratch for the im2col tile
# ---------------------------------------------------------------------------
def motif_kernel(x_ref, w_ref, b_ref, o_ref, patch_ref, *, K, C_in, TL, stride):
    # In-kernel unfold: K shifted (static-offset) slices -> patch rows.
    for k in range(K):
        if stride == 1:
            sl = x_ref[:, k:k + TL]
        else:
            sl = x_ref[:, pl.ds(k, TL, stride=stride)]
        patch_ref[k * C_in:(k + 1) * C_in, :] = sl
    acc = jnp.dot(w_ref[...], patch_ref[...].astype(w_ref.dtype),
                  preferred_element_type=jnp.float32)
    o_ref[...] = (acc + b_ref[...]).astype(o_ref.dtype)


def motif_layer_pallas(x, conv_w, conv_scale, conv_bias, *, stride):
    """x: (B, 4, L) float32 NCL.  Returns (B, 256, L_out) float32 (PyTorch NCL)."""
    B, C_in, L = x.shape
    C_out, _, K = conv_w.shape
    L_out = (L - K) // stride + 1
    CK = C_in * K

    # --- balanced lane tiling of L_out (TL multiple of 128 -> unmasked stores)
    TL_MAX = 512
    n_l = _cdiv(L_out, TL_MAX)
    if B * n_l < 2 and L_out >= 256:
        n_l = 2                                   # keep both v7x TensorCores busy
    TL = _round_up(_cdiv(L_out, n_l), 128)
    L_out_pad = n_l * TL

    # --- per-tile input windows (overlap only by the K-1 halo, no 12x im2col)
    W2 = _round_up((TL - 1) * stride + K, 128)    # window length per tile
    L_need = (n_l - 1) * TL * stride + W2
    if L_need > L:
        x = jnp.pad(x, ((0, 0), (0, 0), (0, L_need - L)))
    tiles = [lax.slice_in_dim(x, j * TL * stride, j * TL * stride + W2, axis=2)
             for j in range(n_l)]
    x_tiles = jnp.stack(tiles, axis=1)            # (B, n_l, C_in, W2)

    # --- fold scale into the weights, reorder to [k*C_in + c], cast to bf16 --
    w_kc = (jnp.transpose(conv_w, (0, 2, 1)).reshape(C_out, CK)
            * conv_scale[:, None]).astype(jnp.bfloat16)       # (C_out, CK)
    bias_col = conv_bias.reshape(C_out, 1).astype(jnp.float32)  # (C_out, 1)

    kernel = functools.partial(motif_kernel, K=K, C_in=C_in, TL=TL, stride=stride)
    out = pl.pallas_call(
        kernel,
        out_shape=jax.ShapeDtypeStruct((B, C_out, L_out_pad), jnp.float32),
        grid=(B, n_l),
        in_specs=[
            pl.BlockSpec((None, None, C_in, W2), lambda b, j: (b, j, 0, 0)),
            pl.BlockSpec((C_out, CK), lambda b, j: (0, 0)),
            pl.BlockSpec((C_out, 1), lambda b, j: (0, 0)),
        ],
        out_specs=pl.BlockSpec((None, C_out, TL), lambda b, j: (b, 0, j)),
        scratch_shapes=[pltpu.VMEM((CK, TL), jnp.float32)],
        compiler_params=pltpu.CompilerParams(
            dimension_semantics=("parallel", "parallel")),
    )(x_tiles, w_kc, bias_col)

    if L_out_pad != L_out:
        out = out[:, :, :L_out]
    return out


# ---------------------------------------------------------------------------
# Pure-JAX references for correctness checks.
# ---------------------------------------------------------------------------
def motif_layer_ref(x, conv_w, conv_scale, conv_bias, *, stride):
    y = lax.conv_general_dilated(
        x, conv_w, window_strides=(stride,), padding="VALID",
        dimension_numbers=("NCH", "OIH", "NCH"))
    return y * conv_scale[None, :, None] + conv_bias.reshape(1, -1, 1)


def motif_layer_ref_bf16(x, conv_w, conv_scale, conv_bias, *, stride):
    # Same operand quantization as the kernel (bf16 patches and scale-folded
    # bf16 weights, f32 accumulation) so the comparison tolerance stays tight.
    xq = x.astype(jnp.bfloat16).astype(jnp.float32)
    wq = ((conv_w * conv_scale[:, None, None])
          .astype(jnp.bfloat16).astype(jnp.float32))
    y = lax.conv_general_dilated(
        xq, wq, window_strides=(stride,), padding="VALID",
        dimension_numbers=("NCH", "OIH", "NCH"))
    return y + conv_bias.reshape(1, -1, 1)


if __name__ == "__main__":
    # Module-implied dimensions: in_channels=4, out_channels=256, kernel=12.
    B = 2
    window_size = 64
    stride = 1
    num_of_response = 3          # linreg out_features (unused in forward path)
    C_in, C_out, K = 4, 256, 12
    L_out = (window_size - K) // stride + 1

    key = jax.random.PRNGKey(0)
    k_x, k_w, k_s, k_b, k_lin = jax.random.split(key, 5)

    # Deterministic synthetic parameters (module default init is scale=ones /
    # bias=zeros; random values here exercise the affine path).
    x = jax.random.normal(k_x, (B, C_in, window_size), jnp.float32)
    conv_w = jax.random.normal(k_w, (C_out, C_in, K), jnp.float32) * 0.1
    conv_scale = 1.0 + 0.1 * jax.random.normal(k_s, (C_out,), jnp.float32)
    conv_bias = 0.1 * jax.random.normal(k_b, (1, C_out, 1), jnp.float32)
    # linreg params (constructed per __init__, never applied — see TODO above)
    linreg_w = jax.random.normal(k_lin, (num_of_response, C_out // 2), jnp.float32)

    run = jax.jit(functools.partial(motif_layer_pallas, stride=stride))
    out = jax.block_until_ready(run(x, conv_w, conv_scale, conv_bias))
    assert out.shape == (B, C_out, L_out), out.shape

    # Tight check against a reference using the same bf16 operand quantization.
    ref_q = motif_layer_ref_bf16(x, conv_w, conv_scale, conv_bias, stride=stride)
    assert jnp.allclose(out, ref_q, atol=2e-3, rtol=2e-3), \
        float(jnp.max(jnp.abs(out - ref_q)))

    # Loose sanity check against the full-f32 reference (bf16 operand rounding).
    ref_f = motif_layer_ref(x, conv_w, conv_scale, conv_bias, stride=stride)
    assert jnp.allclose(out, ref_f, atol=1e-1, rtol=1e-1), \
        float(jnp.max(jnp.abs(out - ref_f)))

    print("KERNEL_OK")
</pallas_src>

<mosaic_0001>
module attributes {stable_mosaic.version = 11 : i64} {
  func.func @motif_kernel(%arg0: i32, %arg1: i32, %arg2: memref<1x1x4x256xf32, #tpu.memory_space<vmem>>, %arg3: memref<256x48xbf16, #tpu.memory_space<vmem>>, %arg4: memref<256x1xf32, #tpu.memory_space<vmem>>, %arg5: memref<1x256x128xf32, #tpu.memory_space<vmem>>, %arg6: memref<48x128xf32, #tpu.memory_space<vmem>>) attributes {dimension_semantics = [#tpu.dimension_semantics<parallel>, #tpu.dimension_semantics<parallel>], iteration_bounds = array<i64: 2, 1>, scalar_prefetch = 0 : i64, scratch_operands = 1 : i64, tpu.core_type = #tpu.core_type<tc>, window_params = [{transform_indices = @transform_0, window_bounds = array<i64: 1, 1, 4, 256>}, {pipeline_mode = #tpu.pipeline_mode<synchronous>, transform_indices = @transform_1, window_bounds = array<i64: 256, 48>}, {pipeline_mode = #tpu.pipeline_mode<synchronous>, transform_indices = @transform_2, window_bounds = array<i64: 256, 1>}, {transform_indices = @transform_3, window_bounds = array<i64: 1, 256, 128>}]} {
    %c0 = arith.constant 0 : index
    %c0_0 = arith.constant 0 : index
    %c0_1 = arith.constant 0 : index
    %c0_2 = arith.constant 0 : index
    %0 = vector.load %arg2[%c0, %c0_0, %c0_1, %c0_2] : memref<1x1x4x256xf32, #tpu.memory_space<vmem>>, vector<1x1x4x128xf32>
    %1 = vector.shape_cast %0 : vector<1x1x4x128xf32> to vector<4x128xf32>
    %c0_3 = arith.constant 0 : index
    %c0_4 = arith.constant 0 : index
    %2 = vector.load %arg6[%c0_3, %c0_4] : memref<48x128xf32, #tpu.memory_space<vmem>>, vector<4x128xf32>
    tpu.vector_store %arg6[%c0_3, %c0_4], %1 {strides = array<i32>} : memref<48x128xf32, #tpu.memory_space<vmem>>, vector<4x128xf32>,
    %c0_5 = arith.constant 0 : index
    %c0_6 = arith.constant 0 : index
    %c0_7 = arith.constant 0 : index
    %c1 = arith.constant 1 : index
    %3 = vector.load %arg2[%c0_5, %c0_6, %c0_7, %c1] : memref<1x1x4x256xf32, #tpu.memory_space<vmem>>, vector<1x1x4x128xf32>
    %4 = vector.shape_cast %3 : vector<1x1x4x128xf32> to vector<4x128xf32>
    %c4 = arith.constant 4 : index
    %c0_8 = arith.constant 0 : index
    %5 = vector.load %arg6[%c4, %c0_8] : memref<48x128xf32, #tpu.memory_space<vmem>>, vector<4x128xf32>
    tpu.vector_store %arg6[%c4, %c0_8], %4 {strides = array<i32>} : memref<48x128xf32, #tpu.memory_space<vmem>>, vector<4x128xf32>,
    %c0_9 = arith.constant 0 : index
    %c0_10 = arith.constant 0 : index
    %c0_11 = arith.constant 0 : index
    %c2 = arith.constant 2 : index
    %6 = vector.load %arg2[%c0_9, %c0_10, %c0_11, %c2] : memref<1x1x4x256xf32, #tpu.memory_space<vmem>>, vector<1x1x4x128xf32>
    %7 = vector.shape_cast %6 : vector<1x1x4x128xf32> to vector<4x128xf32>
    %c8 = arith.constant 8 : index
    %c0_12 = arith.constant 0 : index
    %8 = vector.load %arg6[%c8, %c0_12] : memref<48x128xf32, #tpu.memory_space<vmem>>, vector<4x128xf32>
    tpu.vector_store %arg6[%c8, %c0_12], %7 {strides = array<i32>} : memref<48x128xf32, #tpu.memory_space<vmem>>, vector<4x128xf32>,
    %c0_13 = arith.constant 0 : index
    %c0_14 = arith.constant 0 : index
    %c0_15 = arith.constant 0 : index
    %c3 = arith.constant 3 : index
    %9 = vector.load %arg2[%c0_13, %c0_14, %c0_15, %c3] : memref<1x1x4x256xf32, #tpu.memory_space<vmem>>, vector<1x1x4x128xf32>
    %10 = vector.shape_cast %9 : vector<1x1x4x128xf32> to vector<4x128xf32>
    %c12 = arith.constant 12 : index
    %c0_16 = arith.constant 0 : index
    %11 = vector.load %arg6[%c12, %c0_16] : memref<48x128xf32, #tpu.memory_space<vmem>>, vector<4x128xf32>
    tpu.vector_store %arg6[%c12, %c0_16], %10 {strides = array<i32>} : memref<48x128xf32, #tpu.memory_space<vmem>>, vector<4x128xf32>,
    %c0_17 = arith.constant 0 : index
    %c0_18 = arith.constant 0 : index
    %c0_19 = arith.constant 0 : index
    %c4_20 = arith.constant 4 : index
    %12 = vector.load %arg2[%c0_17, %c0_18, %c0_19, %c4_20] : memref<1x1x4x256xf32, #tpu.memory_space<vmem>>, vector<1x1x4x128xf32>
    %13 = vector.shape_cast %12 : vector<1x1x4x128xf32> to vector<4x128xf32>
    %c16 = arith.constant 16 : index
    %c0_21 = arith.constant 0 : index
    %14 = vector.load %arg6[%c16, %c0_21] : memref<48x128xf32, #tpu.memory_space<vmem>>, vector<4x128xf32>
    tpu.vector_store %arg6[%c16, %c0_21], %13 {strides = array<i32>} : memref<48x128xf32, #tpu.memory_space<vmem>>, vector<4x128xf32>,
    %c0_22 = arith.constant 0 : index
    %c0_23 = arith.constant 0 : index
    %c0_24 = arith.constant 0 : index
    %c5 = arith.constant 5 : index
    %15 = vector.load %arg2[%c0_22, %c0_23, %c0_24, %c5] : memref<1x1x4x256xf32, #tpu.memory_space<vmem>>, vector<1x1x4x128xf32>
    %16 = vector.shape_cast %15 : vector<1x1x4x128xf32> to vector<4x128xf32>
    %c20 = arith.constant 20 : index
    %c0_25 = arith.constant 0 : index
    %17 = vector.load %arg6[%c20, %c0_25] : memref<48x128xf32, #tpu.memory_space<vmem>>, vector<4x128xf32>
    tpu.vector_store %arg6[%c20, %c0_25], %16 {strides = array<i32>} : memref<48x128xf32, #tpu.memory_space<vmem>>, vector<4x128xf32>,
    %c0_26 = arith.constant 0 : index
    %c0_27 = arith.constant 0 : index
    %c0_28 = arith.constant 0 : index
    %c6 = arith.constant 6 : index
    %18 = vector.load %arg2[%c0_26, %c0_27, %c0_28, %c6] : memref<1x1x4x256xf32, #tpu.memory_space<vmem>>, vector<1x1x4x128xf32>
    %19 = vector.shape_cast %18 : vector<1x1x4x128xf32> to vector<4x128xf32>
    %c24 = arith.constant 24 : index
    %c0_29 = arith.constant 0 : index
    %20 = vector.load %arg6[%c24, %c0_29] : memref<48x128xf32, #tpu.memory_space<vmem>>, vector<4x128xf32>
    tpu.vector_store %arg6[%c24, %c0_29], %19 {strides = array<i32>} : memref<48x128xf32, #tpu.memory_space<vmem>>, vector<4x128xf32>,
    %c0_30 = arith.constant 0 : index
    %c0_31 = arith.constant 0 : index
    %c0_32 = arith.constant 0 : index
    %c7 = arith.constant 7 : index
    %21 = vector.load %arg2[%c0_30, %c0_31, %c0_32, %c7] : memref<1x1x4x256xf32, #tpu.memory_space<vmem>>, vector<1x1x4x128xf32>
    %22 = vector.shape_cast %21 : vector<1x1x4x128xf32> to vector<4x128xf32>
    %c28 = arith.constant 28 : index
    %c0_33 = arith.constant 0 : index
    %23 = vector.load %arg6[%c28, %c0_33] : memref<48x128xf32, #tpu.memory_space<vmem>>, vector<4x128xf32>
    tpu.vector_store %arg6[%c28, %c0_33], %22 {strides = array<i32>} : memref<48x128xf32, #tpu.memory_space<vmem>>, vector<4x128xf32>,
    %c0_34 = arith.constant 0 : index
    %c0_35 = arith.constant 0 : index
    %c0_36 = arith.constant 0 : index
    %c8_37 = arith.constant 8 : index
    %24 = vector.load %arg2[%c0_34, %c0_35, %c0_36, %c8_37] : memref<1x1x4x256xf32, #tpu.memory_space<vmem>>, vector<1x1x4x128xf32>
    %25 = vector.shape_cast %24 : vector<1x1x4x128xf32> to vector<4x128xf32>
    %c32 = arith.constant 32 : index
    %c0_38 = arith.constant 0 : index
    %26 = vector.load %arg6[%c32, %c0_38] : memref<48x128xf32, #tpu.memory_space<vmem>>, vector<4x128xf32>
    tpu.vector_store %arg6[%c32, %c0_38], %25 {strides = array<i32>} : memref<48x128xf32, #tpu.memory_space<vmem>>, vector<4x128xf32>,
    %c0_39 = arith.constant 0 : index
    %c0_40 = arith.constant 0 : index
    %c0_41 = arith.constant 0 : index
    %c9 = arith.constant 9 : index
    %27 = vector.load %arg2[%c0_39, %c0_40, %c0_41, %c9] : memref<1x1x4x256xf32, #tpu.memory_space<vmem>>, vector<1x1x4x128xf32>
    %28 = vector.shape_cast %27 : vector<1x1x4x128xf32> to vector<4x128xf32>
    %c36 = arith.constant 36 : index
    %c0_42 = arith.constant 0 : index
    %29 = vector.load %arg6[%c36, %c0_42] : memref<48x128xf32, #tpu.memory_space<vmem>>, vector<4x128xf32>
    tpu.vector_store %arg6[%c36, %c0_42], %28 {strides = array<i32>} : memref<48x128xf32, #tpu.memory_space<vmem>>, vector<4x128xf32>,
    %c0_43 = arith.constant 0 : index
    %c0_44 = arith.constant 0 : index
    %c0_45 = arith.constant 0 : index
    %c10 = arith.constant 10 : index
    %30 = vector.load %arg2[%c0_43, %c0_44, %c0_45, %c10] : memref<1x1x4x256xf32, #tpu.memory_space<vmem>>, vector<1x1x4x128xf32>
    %31 = vector.shape_cast %30 : vector<1x1x4x128xf32> to vector<4x128xf32>
    %c40 = arith.constant 40 : index
    %c0_46 = arith.constant 0 : index
    %32 = vector.load %arg6[%c40, %c0_46] : memref<48x128xf32, #tpu.memory_space<vmem>>, vector<4x128xf32>
    tpu.vector_store %arg6[%c40, %c0_46], %31 {strides = array<i32>} : memref<48x128xf32, #tpu.memory_space<vmem>>, vector<4x128xf32>,
    %c0_47 = arith.constant 0 : index
    %c0_48 = arith.constant 0 : index
    %c0_49 = arith.constant 0 : index
    %c11 = arith.constant 11 : index
    %33 = vector.load %arg2[%c0_47, %c0_48, %c0_49, %c11] : memref<1x1x4x256xf32, #tpu.memory_space<vmem>>, vector<1x1x4x128xf32>
    %34 = vector.shape_cast %33 : vector<1x1x4x128xf32> to vector<4x128xf32>
    %c44 = arith.constant 44 : index
    %c0_50 = arith.constant 0 : index
    %35 = vector.load %arg6[%c44, %c0_50] : memref<48x128xf32, #tpu.memory_space<vmem>>, vector<4x128xf32>
    tpu.vector_store %arg6[%c44, %c0_50], %34 {strides = array<i32>} : memref<48x128xf32, #tpu.memory_space<vmem>>, vector<4x128xf32>,
    %c0_51 = arith.constant 0 : index
    %c0_52 = arith.constant 0 : index
    %36 = vector.load %arg3[%c0_51, %c0_52] : memref<256x48xbf16, #tpu.memory_space<vmem>>, vector<256x48xbf16>
    %c0_53 = arith.constant 0 : index
    %c0_54 = arith.constant 0 : index
    %37 = vector.load %arg6[%c0_53, %c0_54] : memref<48x128xf32, #tpu.memory_space<vmem>>, vector<48x128xf32>
    %38 = arith.truncf %37 : vector<48x128xf32> to vector<48x128xbf16>
    %cst = arith.constant dense<0.000000e+00> : vector<256x128xf32>
    %39 = tpu.matmul %36, %38, %cst {dimension_numbers = #tpu.dot_dimension_numbers<[1], [0], [0], [1], [0, 0, 1, 1], [], []>} : vector<256x48xbf16>, vector<48x128xbf16>, vector<256x128xf32> -> vector<256x128xf32>
    %c0_55 = arith.constant 0 : index
    %c0_56 = arith.constant 0 : index
    %40 = vector.load %arg4[%c0_55, %c0_56] : memref<256x1xf32, #tpu.memory_space<vmem>>, vector<256x1xf32>
    %41 = vector.broadcast %40 : vector<256x1xf32> to vector<256x128xf32>
    %42 = arith.addf %39, %41 : vector<256x128xf32>
    %c0_57 = arith.constant 0 : index
    %c0_58 = arith.constant 0 : index
    %c0_59 = arith.constant 0 : index
    %43 = vector.load %arg5[%c0_57, %c0_58, %c0_59] : memref<1x256x128xf32, #tpu.memory_space<vmem>>, vector<1x256x128xf32>
    %44 = vector.shape_cast %43 : vector<1x256x128xf32> to vector<256x128xf32>
    %45 = vector.shape_cast %42 : vector<256x128xf32> to vector<1x256x128xf32>
    tpu.vector_store %arg5[%c0_57, %c0_58, %c0_59], %45 {strides = array<i32>} : memref<1x256x128xf32, #tpu.memory_space<vmem>>, vector<1x256x128xf32>,
    return
  }
  func.func @transform_0(%arg0: i32, %arg1: i32) -> (i32, i32, i32, i32) {
    %c0_i32 = arith.constant 0 : i32
    %c0_i32_0 = arith.constant 0 : i32
    %c0_i32_1 = arith.constant 0 : i32
    return %arg0, %arg1, %c0_i32, %c0_i32_0 : i32, i32, i32, i32
  }
  func.func @transform_1(%arg0: i32, %arg1: i32) -> (i32, i32) {
    %c0_i32 = arith.constant 0 : i32
    %c0_i32_0 = arith.constant 0 : i32
    %c0_i32_1 = arith.constant 0 : i32
    return %c0_i32, %c0_i32_0 : i32, i32
  }
  func.func @transform_2(%arg0: i32, %arg1: i32) -> (i32, i32) {
    %c0_i32 = arith.constant 0 : i32
    %c0_i32_0 = arith.constant 0 : i32
    %c0_i32_1 = arith.constant 0 : i32
    return %c0_i32, %c0_i32_0 : i32, i32
  }
  func.func @transform_3(%arg0: i32, %arg1: i32) -> (i32, i32, i32) {
    %c0_i32 = arith.constant 0 : i32
    %c0_i32_0 = arith.constant 0 : i32
    return %arg0, %c0_i32, %arg1 : i32, i32, i32
  }
}

</mosaic_0001>

<bundles_post_ra>
// kernel: motif_layer_pallas.1
= control target key start
LH: loop header
LB: loop body
LE: loop exit
PB: predicated region body
PF: predicated region fallthrough
CT: control target
= control target key end

     0   :  { %s1189_s12 = smov 0   ;;  %s1191_s13 = smov 0   ;;  %s1447_s0 = inlined_call_operand.vmem [shape: f32[2,1,4,256], index: 0, kind: input, shape index: {}]   ;;  %s1448_s1 = inlined_call_operand.vmem [shape: bf16[256,48], index: 1, kind: input, shape index: {}]   ;;  %s1449_s2 = inlined_call_operand.vmem [shape: f32[256,1], index: 2, kind: input, shape index: {}]   ;;  %s1450_s3 = inlined_call_operand.vmem [shape: f32[2,256,128], index: 3, kind: output, shape index: {}]  }
   0x1   :  { %s1193_s14 = smov 0  }
   0x2 LB: > { %s25_s15 = sadd.s32 1, %s1151_s13  ;;  %p974_p0 = scmp.ge.s32.totalorder %s1155_s14, 1  ;;  %s1155_s14 = sphi %s1193_s14, %s13_s14   ;;  %s1151_s13 = sphi %s1191_s13, %s1452_s13   ;;  %s1147_s12 = sphi %s1189_s12, %s1451_s12  }
   0x3   : > { %p27_p1 = scmp.ge.s32.totalorder %s25_s15, 2  ;;  %p157_p2 = scmp.lt.s32.totalorder %s1155_s14, 3 }
   0x5   : > { %s1454_s15 = smov (%p27_p1, %s25_s15), 0  ;;  %p158_p3 = pnand %p974_p0, %p157_p2 }
   0x6   : > { %p188_p4 = scmp.lt.s32.totalorder (!%p158_p3), %s1147_s12, 1  ;;  %s1157_s20 = smov (!%p158_p3), 119  }
   0x7   : > { %161 = sbr.rel (%p158_p3) target bundleno = 412 (0x19c), region = 32  ;;  %s1158_s21 = smov (!%p158_p3), 120  }
   0x8   : > { %s1159_s22 = smov (!%p158_p3), 118   ;;  %s1160_s23 = smov (!%p158_p3), 117  }
   0x9   : > { %s1161_s24 = smov (!%p158_p3), 124   ;;  %s1162_s25 = smov (!%p158_p3), 123  }
   0xa   : > { %s1164_s26 = smov (!%p158_p3), 122   ;;  %s1165_s27 = smov (!%p158_p3), 121  }
   0xb   : > { %s1166_s28 = smov (!%p158_p3), 127   ;;  %s1167_s29 = smov (!%p158_p3), 126  }
   0xc   : > { %s1456_s12 = smov (!%p188_p4, %s1147_s12), 1  ;;  %v1163_v3 = vmov 0   ;;  %v1117_v4 = vld [vmem:[%s1448_s1] sm:$0xff]   ;;  %vm642_vm0 = vcmask 392192   ;;  %s1168_s7 = smov 125   ;;  %v371_v7 = vld [vmem:[%s1449_s2 + $0x8] sm:$0xff] }
   0xd   : > { %s1013_s16 = sshll.u32 %s1456_s12, 3  ;;  %1115 = vset.pattern.permute.xlu1 %v1163_v3  ;;  %1114 = vset.pattern.permute.xlu0 %v1163_v3  ;;  %v1118_v5 = vld [vmem:[%s1448_s1 + $0x40] sm:$0xff]   ;;  %v373_v8 = vld [vmem:[%s1449_s2 + $0x18] sm:$0xff]  ;;  %v372_v9 = vld [vmem:[%s1449_s2 + $0x10] sm:$0xff]  ;;  %vm303_vm1 = vcmask 973824   ;;  %vm314_vm2 = vcmask 965632  }
   0xe   : > { %s196_s19 = scalar_lea.vmem %s1447_s0, %s1013_s16  ;;  %v370_v6 = vld [vmem:[%s1449_s2] sm:$0xff]  ;;  %1040 = vmatprep.mubr.msk.bf16.mxu0 %vm642_vm0, %v1117_v4  ;;  %1056 = vmatprep.mubr.msk.bf16.mxu1 %vm642_vm0, %v1118_v5  ;;  %v375_v10 = vld [vmem:[%s1449_s2 + $0x28] sm:$0xff]  ;;  %v377_v12 = vld [vmem:[%s1449_s2 + $0x38] sm:$0xff]  ;;  %vm292_vm3 = vcmask 982016   ;;  %vm325_vm4 = vcmask 957440   ;;  %vm248_vm5 = vcmask 1014784  }
   0xf   : > { %v296_v0 = vld [vmem:[%s196_s19] sm:$0xff]  ;;  %v376_v13 = vld [vmem:[%s1449_s2 + $0x30] sm:$0xff]  ;;  %v379_v14 = vld [vmem:[%s1449_s2 + $0x48] sm:$0xff]  ;;  %vm259_vm6 = vcmask 1006592   ;;  %vm270_vm7 = vcmask 998400   ;;  %vm281_vm8 = vcmask 990208  }
  0x10   : > { %299 = vrot.lane.b32.xlu1 %v296_v0, %s1157_s20  ;;  %v298_v1 = vcombine.high %v296_v0, %v296_v0  ;;  %288 = vrot.lane.b32.xlu0 %v296_v0, %s1158_s21  ;;  %v206_v2 = vld [vmem:[%s196_s19] sm:$0xf]  ;;  %v381_v16 = vld [vmem:[%s1449_s2 + $0x58] sm:$0xff]  ;;  %vm215_vm9 = vcmask 1039360   ;;  %vm226_vm10 = vcmask 1031168   ;;  %vm237_vm11 = vcmask 1022976  }
  0x11   : > { %207 = vst [vmem:[#allocation2] sm:$0xf] %v206_v2  ;;  %v374_v11 = vld [vmem:[%s1449_s2 + $0x20] sm:$0xff]  ;;  %v380_v17 = vld [vmem:[%s1449_s2 + $0x50] sm:$0xff]  ;;  %v383_v18 = vld [vmem:[%s1449_s2 + $0x68] sm:$0xff]  ;;  %s1014_s8 = sshll.u32 %s1456_s12, 8 }
  0x12   : > { %v378_v15 = vld [vmem:[%s1449_s2 + $0x40] sm:$0xff]  ;;  %v385_v20 = vld [vmem:[%s1449_s2 + $0x78] sm:$0xff]  ;;  %v384_v21 = vld [vmem:[%s1449_s2 + $0x70] sm:$0xff]  ;;  %s1395_s11 = scalar_lea.vmem %s1450_s3, %s1014_s8 }
  0x13   : > { %v382_v19 = vld [vmem:[%s1449_s2 + $0x60] sm:$0xff]  ;;  %v387_v22 = vld [vmem:[%s1449_s2 + $0x88] sm:$0xff]  ;;  %v389_v24 = vld [vmem:[%s1449_s2 + $0x98] sm:$0xff] }
  0x14   : > { %301 = vrot.lane.b32.xlu1 %v298_v1, %s1157_s20  ;;  %310 = vrot.lane.b32.xlu0 %v296_v0, %s1159_s22  ;;  %v386_v23 = vld [vmem:[%s1449_s2 + $0x80] sm:$0xff]  ;;  %v388_v25 = vld [vmem:[%s1449_s2 + $0x90] sm:$0xff] }
  0x15   : > { %v391_v26 = vld [vmem:[%s1449_s2 + $0xa8] sm:$0xff]  ;;  %v390_v27 = vld [vmem:[%s1449_s2 + $0xa0] sm:$0xff]  ;;  %v393_v28 = vld [vmem:[%s1449_s2 + $0xb8] sm:$0xff] }
  0x16   : > { %v392_v29 = vld [vmem:[%s1449_s2 + $0xb0] sm:$0xff]  ;;  %v395_v30 = vld [vmem:[%s1449_s2 + $0xc8] sm:$0xff]  ;;  %v394_v31 = vld [vmem:[%s1449_s2 + $0xc0] sm:$0xff] }
  0x17   : > { %v397_v32 = vld [vmem:[%s1449_s2 + $0xd8] sm:$0xff]  ;;  %v396_v33 = vld [vmem:[%s1449_s2 + $0xd0] sm:$0xff]  ;;  %v399_v34 = vld [vmem:[%s1449_s2 + $0xe8] sm:$0xff] }
  0x18   : > { %312 = vrot.lane.b32.xlu1 %v298_v1, %s1159_s22  ;;  %290 = vrot.lane.b32.xlu0 %v298_v1, %s1158_s21  ;;  %v398_v35 = vld [vmem:[%s1449_s2 + $0xe0] sm:$0xff]  ;;  %v401_v36 = vld [vmem:[%s1449_s2 + $0xf8] sm:$0xff] }
  0x19   : > { %v400_v37 = vld [vmem:[%s1449_s2 + $0xf0] sm:$0xff] }
  0x1c   : > { %323 = vrot.lane.b32.xlu1 %v298_v1, %s1160_s23  ;;  %321 = vrot.lane.b32.xlu0 %v296_v0, %s1160_s23 }
  0x20   : > { %244 = vrot.lane.b32.xlu0 %v296_v0, %s1161_s24  ;;  %246 = vrot.lane.b32.xlu1 %v298_v1, %s1161_s24 }
  0x24   : > { %255 = vrot.lane.b32.xlu0 %v296_v0, %s1162_s25  ;;  %257 = vrot.lane.b32.xlu1 %v298_v1, %s1162_s25 }
  0x28   : > { %266 = vrot.lane.b32.xlu0 %v296_v0, %s1164_s26  ;;  %268 = vrot.lane.b32.xlu1 %v298_v1, %s1164_s26 }
  0x2c   : > { %277 = vrot.lane.b32.xlu0 %v296_v0, %s1165_s27  ;;  %279 = vrot.lane.b32.xlu1 %v298_v1, %s1165_s27 }
  0x30   : > { %211 = vrot.lane.b32.xlu0 %v296_v0, %s1166_s28  ;;  %213 = vrot.lane.b32.xlu1 %v298_v1, %s1166_s28 }
  0x34   : > { %222 = vrot.lane.b32.xlu0 %v296_v0, %s1167_s29  ;;  %224 = vrot.lane.b32.xlu1 %v298_v1, %s1167_s29 }
  0x38   : > { %233 = vrot.lane.b32.xlu0 %v296_v0, %s1168_s7  ;;  %235 = vrot.lane.b32.xlu1 %v298_v1, %s1168_s7 }
  0x3c   : > { %404 = vperm.xlu0 %1114, %v370_v6   ;;  %409 = vperm.xlu1 %1115, %v371_v7  }
  0x40   : > { %419 = vperm.xlu0 %1114, %v373_v8   ;;  %414 = vperm.xlu1 %1115, %v372_v9  }
  0x44   : > { %429 = vperm.xlu0 %1114, %v375_v10   ;;  %424 = vperm.xlu1 %1115, %v374_v11  }
  0x48   : > { %439 = vperm.xlu0 %1114, %v377_v12   ;;  %434 = vperm.xlu1 %1115, %v376_v13  }
  0x4c   : > { %449 = vperm.xlu0 %1114, %v379_v14   ;;  %444 = vperm.xlu1 %1115, %v378_v15  }
  0x50   : > { %459 = vperm.xlu0 %1114, %v381_v16   ;;  %454 = vperm.xlu1 %1115, %v380_v17   ;;  %v1119_v16 = vld [vmem:[%s1448_s1 + $0x8] sm:$0xff]  }
  0x51   : > { %v1120_v17 = vld [vmem:[%s1448_s1 + $0x48] sm:$0xff]  }
  0x54   : > { %469 = vperm.xlu0 %1114, %v383_v18   ;;  %464 = vperm.xlu1 %1115, %v382_v19   ;;  %v1121_v18 = vld [vmem:[%s1448_s1 + $0x10] sm:$0xff]  }
  0x55   : > { %v1122_v19 = vld [vmem:[%s1448_s1 + $0x50] sm:$0xff]  }
  0x58   : > { %479 = vperm.xlu0 %1114, %v385_v20   ;;  %474 = vperm.xlu1 %1115, %v384_v21   ;;  %v1123_v20 = vld [vmem:[%s1448_s1 + $0x18] sm:$0xff]  }
  0x59   : > { %v1124_v21 = vld [vmem:[%s1448_s1 + $0x58] sm:$0xff]  }
  0x5c   : > { %489 = vperm.xlu0 %1114, %v387_v22   ;;  %484 = vperm.xlu1 %1115, %v386_v23   ;;  %v1125_v22 = vld [vmem:[%s1448_s1 + $0x20] sm:$0xff]  }
  0x5d   : > { %v1126_v23 = vld [vmem:[%s1448_s1 + $0x60] sm:$0xff]  }
  0x60   : > { %499 = vperm.xlu0 %1114, %v389_v24   ;;  %494 = vperm.xlu1 %1115, %v388_v25   ;;  %v1127_v24 = vld [vmem:[%s1448_s1 + $0x28] sm:$0xff]  }
  0x61   : > { %v1128_v25 = vld [vmem:[%s1448_s1 + $0x68] sm:$0xff]  }
  0x64   : > { %509 = vperm.xlu0 %1114, %v391_v26   ;;  %504 = vperm.xlu1 %1115, %v390_v27   ;;  %v1129_v26 = vld [vmem:[%s1448_s1 + $0x30] sm:$0xff]  }
  0x65   : > { %v1130_v27 = vld [vmem:[%s1448_s1 + $0x70] sm:$0xff]  }
  0x68   : > { %519 = vperm.xlu0 %1114, %v393_v28   ;;  %514 = vperm.xlu1 %1115, %v392_v29   ;;  %v1131_v28 = vld [vmem:[%s1448_s1 + $0x38] sm:$0xff]  }
  0x69   : > { %v1132_v29 = vld [vmem:[%s1448_s1 + $0x78] sm:$0xff]  }
  0x6c   : > { %529 = vperm.xlu0 %1114, %v395_v30   ;;  %524 = vperm.xlu1 %1115, %v394_v31  }
  0x70   : > { %539 = vperm.xlu0 %1114, %v397_v32   ;;  %534 = vperm.xlu1 %1115, %v396_v33  }
  0x74   : > { %549 = vperm.xlu0 %1114, %v399_v34   ;;  %544 = vperm.xlu1 %1115, %v398_v35  }
  0x78   : > { %559 = vperm.xlu0 %1114, %v401_v36   ;;  %554 = vperm.xlu1 %1115, %v400_v37  }
  0x82   : > { %v300_v38 = vpop.permute.xlu1 %299  ;;  %v289_v39 = vpop.permute.xlu0 %288 }
  0x86   : > { %v302_v40 = vpop.permute.xlu1 %301  ;;  %v311_v41 = vpop.permute.xlu0 %310 }
  0x87   : > { %v304_v42 = vsel %vm303_vm1, %v300_v38, %v302_v40 }
  0x88   : > { %306 = vst [vmem:[#allocation2 + $0x24] sm:$0xf] %v304_v42 }
  0x8a   : > { %v313_v43 = vpop.permute.xlu1 %312  ;;  %v291_v44 = vpop.permute.xlu0 %290 }
  0x8b   : > { %v315_v45 = vsel %vm314_vm2, %v311_v41, %v313_v43  ;;  %v293_v46 = vsel %vm292_vm3, %v289_v39, %v291_v44 }
  0x8c   : > { %317 = vst [vmem:[#allocation2 + $0x28] sm:$0xf] %v315_v45  ;;  %295 = vst [vmem:[#allocation2 + $0x20] sm:$0xf] %v293_v46 }
  0x8e   : > { %v324_v47 = vpop.permute.xlu1 %323  ;;  %v322_v48 = vpop.permute.xlu0 %321 }
  0x8f   : > { %v326_v49 = vsel %vm325_vm4, %v322_v48, %v324_v47 }
  0x90   : > { %328 = vst [vmem:[#allocation2 + $0x2c] sm:$0xf] %v326_v49 }
  0x92   : > { %v245_v50 = vpop.permute.xlu0 %244  ;;  %v247_v51 = vpop.permute.xlu1 %246 }
  0x93   : > { %v249_v52 = vsel %vm248_vm5, %v245_v50, %v247_v51  ;;  %v365_v56 = vld [vmem:[#allocation2 + $0x20] sm:$0xff] }
  0x94   : > { %251 = vst [vmem:[#allocation2 + $0x10] sm:$0xf] %v249_v52 }
  0x96   : > { %v256_v53 = vpop.permute.xlu0 %255  ;;  %v258_v54 = vpop.permute.xlu1 %257 }
  0x97   : > { %v260_v55 = vsel %vm259_vm6, %v256_v53, %v258_v54  ;;  %v366_v57 = vld [vmem:[#allocation2 + $0x28] sm:$0xff] }
  0x98   : > { %262 = vst [vmem:[#allocation2 + $0x14] sm:$0xf] %v260_v55  ;;  %v369_v58 = vpack.c.bf16 %v366_v57, %v365_v56 }
  0x9a   : > { %1034 = vmatprep.subr.bf16.mxu0 %v369_v58  ;;  %1072 = vmatprep.subr.bf16.mxu1 %v369_v58  ;;  %v267_v59 = vpop.permute.xlu0 %266  ;;  %v269_v60 = vpop.permute.xlu1 %268 }
  0x9b   : > { %v271_v61 = vsel %vm270_vm7, %v267_v59, %v269_v60  ;;  %1035 = vmatpush3.bf16.msra.mxu0 %v369_v58  ;;  %1075 = vmatpush3.bf16.msra.mxu1 %v369_v58 }
  0x9c   : > { %273 = vst [vmem:[#allocation2 + $0x18] sm:$0xf] %v271_v61 }
  0x9e   : > { %v278_v62 = vpop.permute.xlu0 %277  ;;  %v280_v63 = vpop.permute.xlu1 %279 }
  0x9f   : > { %v282_v0 = vsel %vm281_vm8, %v278_v62, %v280_v63  ;;  %v363_v7 = vld [vmem:[#allocation2 + $0x10] sm:$0xff] }
  0xa0   : > { %284 = vst [vmem:[#allocation2 + $0x1c] sm:$0xf] %v282_v0 }
  0xa2   : > { %v212_v1 = vpop.permute.xlu0 %211  ;;  %v214_v2 = vpop.permute.xlu1 %213 }
  0xa3   : > { %v216_v3 = vsel %vm215_vm9, %v212_v1, %v214_v2 }
  0xa4   : > { %218 = vst [vmem:[#allocation2 + $0x4] sm:$0xf] %v216_v3 }
  0xa6   : > { %v223_v4 = vpop.permute.xlu0 %222  ;;  %v225_v5 = vpop.permute.xlu1 %224 }
  0xa7   : > { %v227_v6 = vsel %vm226_vm10, %v223_v4, %v225_v5  ;;  %v364_v8 = vld [vmem:[#allocation2 + $0x18] sm:$0xff] }
  0xa8   : > { %229 = vst [vmem:[#allocation2 + $0x8] sm:$0xf] %v227_v6  ;;  %v368_v9 = vpack.c.bf16 %v364_v8, %v363_v7 }
  0xaa   : > { %1036 = vmatprep.subr.bf16.mxu0 %v368_v9  ;;  %1073 = vmatprep.subr.bf16.mxu1 %v368_v9  ;;  %v234_v10 = vpop.permute.xlu0 %233  ;;  %v236_v11 = vpop.permute.xlu1 %235 }
  0xab   : > { %v238_v12 = vsel %vm237_vm11, %v234_v10, %v236_v11  ;;  %1037 = vmatpush3.bf16.msra.mxu0 %v368_v9  ;;  %1076 = vmatpush3.bf16.msra.mxu1 %v368_v9  ;;  %v361_v13 = vld [vmem:[#allocation2] sm:$0xff] }
  0xac   : > { %240 = vst [vmem:[#allocation2 + $0xc] sm:$0xf] %v238_v12 }
  0xb3   : > { %v362_v14 = vld [vmem:[#allocation2 + $0x8] sm:$0xff] }
  0xb4   : > { %v367_v15 = vpack.c.bf16 %v362_v14, %v361_v13 }
  0xb6   : > { %1038 = vmatprep.subr.bf16.mxu0 %v367_v15  ;;  %1074 = vmatprep.subr.bf16.mxu1 %v367_v15 }
  0xb7   : > { %1039 = vmatpush3.bf16.msra.mxu0 %v367_v15  ;;  %1077 = vmatpush3.bf16.msra.mxu1 %v367_v15  ;;  %v410_v30 = vpop.permute.xlu1 %409  ;;  %v405_v31 = vpop.permute.xlu0 %404 }
  0xba   : > { %1041 = vmatmul.mubr.msk.bf16.vlgmr.msra.gmra.mxu0 %vm642_vm0, %v1119_v16  ;;  %1057 = vmatmul.mubr.msk.bf16.vlgmr.msra.gmra.mxu1 %vm642_vm0, %v1120_v17 }
  0xbb   : > { %1044 = vmatprep.mubr.msk.bf16.mxu0 %vm642_vm0, %v1121_v18  ;;  %1060 = vmatprep.mubr.msk.bf16.mxu1 %vm642_vm0, %v1122_v19  ;;  %v415_v32 = vpop.permute.xlu1 %414  ;;  %v420_v33 = vpop.permute.xlu0 %419 }
  0xbf   : > { %v425_v34 = vpop.permute.xlu1 %424  ;;  %v1373_v35 = vpop.permute.xlu0 %429 }
  0xc2   : > { %1045 = vmatmul.mubr.msk.bf16.gmra.mxu0 %vm642_vm0, %v1123_v20  ;;  %1061 = vmatmul.mubr.msk.bf16.gmra.mxu1 %vm642_vm0, %v1124_v21 }
  0xc3   : > { %1048 = vmatprep.mubr.msk.bf16.mxu0 %vm642_vm0, %v1125_v22  ;;  %1064 = vmatprep.mubr.msk.bf16.mxu1 %vm642_vm0, %v1126_v23  ;;  %v435_v36 = vpop.permute.xlu1 %434  ;;  %v440_v37 = vpop.permute.xlu0 %439 }
  0xc7   : > { %v1375_v38 = vpop.permute.xlu1 %444  ;;  %v1377_v39 = vpop.permute.xlu0 %449 }
  0xca   : > { %1049 = vmatmul.mubr.msk.bf16.gmra.mxu0 %vm642_vm0, %v1127_v24  ;;  %1065 = vmatmul.mubr.msk.bf16.gmra.mxu1 %vm642_vm0, %v1128_v25 }
  0xcb   : > { %1052 = vmatprep.mubr.msk.bf16.mxu0 %vm642_vm0, %v1129_v26  ;;  %1068 = vmatprep.mubr.msk.bf16.mxu1 %vm642_vm0, %v1130_v27  ;;  %v1379_v40 = vpop.permute.xlu1 %454  ;;  %v1381_v41 = vpop.permute.xlu0 %459 }
  0xcf   : > { %v1383_v42 = vpop.permute.xlu1 %464  ;;  %v1385_v43 = vpop.permute.xlu0 %469 }
  0xd2   : > { %1053 = vmatmul.mubr.msk.bf16.gmra.mxu0 %vm642_vm0, %v1131_v28  ;;  %1069 = vmatmul.mubr.msk.bf16.gmra.mxu1 %vm642_vm0, %v1132_v29 }
  0xd3   : > { %v1387_v44 = vpop.permute.xlu1 %474  ;;  %v1389_v45 = vpop.permute.xlu0 %479 }
  0xd7   : > { %v485_v46 = vpop.permute.xlu1 %484  ;;  %v490_v47 = vpop.permute.xlu0 %489 }
  0xdb   : > { %v495_v48 = vpop.permute.xlu1 %494  ;;  %v500_v49 = vpop.permute.xlu0 %499 }
  0xdf   : > { %v505_v50 = vpop.permute.xlu1 %504  ;;  %v510_v51 = vpop.permute.xlu0 %509 }
  0xe3   : > { %v515_v52 = vpop.permute.xlu1 %514  ;;  %v520_v59 = vpop.permute.xlu0 %519 }
  0xe7   : > { %v525_v0 = vpop.permute.xlu1 %524  ;;  %v530_v9 = vpop.permute.xlu0 %529 }
  0xeb   : > { %v535_v14 = vpop.permute.xlu1 %534  ;;  %v540_v23 = vpop.permute.xlu0 %539 }
  0xef   : > { %v545_v28 = vpop.permute.xlu1 %544 }
 0x17a   : > { %v1042_v53 = vpop.f32.mrf.mxu0  ;;  %v1058_v54 = vpop.f32.mrf.mxu1 }
 0x17b   : > { %v734_v55 = vadd.f32 %v1042_v53, %v415_v32  ;;  %v798_v56 = vadd.f32 %v1058_v54, %v495_v48 }
 0x17c   : > { %v725_v57 = vpop.f32.mrf.mxu0  ;;  %v789_v58 = vpop.f32.mrf.mxu1 }
 0x17d   : > { %854 = vst [vmem:[%s1395_s11 + $0x10] sm:$0xff] %v734_v55  ;;  %870 = vst [vmem:[%s1395_s11 + $0x90] sm:$0xff] %v798_v56  ;;  %v726_v60 = vadd.f32 %v725_v57, %v405_v31  ;;  %v790_v61 = vadd.f32 %v789_v58, %v485_v46 }
 0x17e   : > { %v1043_v62 = vpop.f32.mrf.mxu0  ;;  %v1059_v63 = vpop.f32.mrf.mxu1 }
 0x17f   : > { %852 = vst [vmem:[%s1395_s11] sm:$0xff] %v726_v60  ;;  %868 = vst [vmem:[%s1395_s11 + $0x80] sm:$0xff] %v790_v61  ;;  %v737_v1 = vadd.f32 %v1043_v62, %v420_v33  ;;  %v801_v2 = vadd.f32 %v1059_v63, %v500_v49  ;;  %v555_v49 = vpop.permute.xlu1 %554 }
 0x180   : > { %v728_v3 = vpop.f32.mrf.mxu0  ;;  %v792_v4 = vpop.f32.mrf.mxu1 }
 0x181   : > { %855 = vst [vmem:[%s1395_s11 + $0x18] sm:$0xff] %v737_v1  ;;  %871 = vst [vmem:[%s1395_s11 + $0x98] sm:$0xff] %v801_v2  ;;  %v729_v5 = vadd.f32 %v728_v3, %v410_v30  ;;  %v793_v6 = vadd.f32 %v792_v4, %v490_v47 }
 0x182   : > { %v1046_v7 = vpop.f32.mrf.mxu0  ;;  %v1062_v8 = vpop.f32.mrf.mxu1 }
 0x183   : > { %853 = vst [vmem:[%s1395_s11 + $0x8] sm:$0xff] %v729_v5  ;;  %869 = vst [vmem:[%s1395_s11 + $0x88] sm:$0xff] %v793_v6  ;;  %v750_v10 = vadd.f32 %v1046_v7, %v435_v36  ;;  %v814_v11 = vadd.f32 %v1062_v8, %v515_v52 }
 0x184   : > { %v741_v12 = vpop.f32.mrf.mxu0  ;;  %v805_v13 = vpop.f32.mrf.mxu1 }
 0x185   : > { %858 = vst [vmem:[%s1395_s11 + $0x30] sm:$0xff] %v750_v10  ;;  %874 = vst [vmem:[%s1395_s11 + $0xb0] sm:$0xff] %v814_v11  ;;  %v742_v15 = vadd.f32 %v741_v12, %v425_v34  ;;  %v806_v16 = vadd.f32 %v805_v13, %v505_v50 }
 0x186   : > { %v1047_v17 = vpop.f32.mrf.mxu0  ;;  %v1063_v18 = vpop.f32.mrf.mxu1 }
 0x187   : > { %856 = vst [vmem:[%s1395_s11 + $0x20] sm:$0xff] %v742_v15  ;;  %872 = vst [vmem:[%s1395_s11 + $0xa0] sm:$0xff] %v806_v16  ;;  %v753_v19 = vadd.f32 %v1047_v17, %v440_v37  ;;  %v817_v20 = vadd.f32 %v1063_v18, %v520_v59  ;;  %v550_v37 = vpop.permute.xlu0 %549 }
 0x188   : > { %v744_v21 = vpop.f32.mrf.mxu0  ;;  %v808_v22 = vpop.f32.mrf.mxu1 }
 0x189   : > { %859 = vst [vmem:[%s1395_s11 + $0x38] sm:$0xff] %v753_v19  ;;  %875 = vst [vmem:[%s1395_s11 + $0xb8] sm:$0xff] %v817_v20  ;;  %v745_v24 = vadd.f32 %v744_v21, %v1373_v35  ;;  %v809_v25 = vadd.f32 %v808_v22, %v510_v51 }
 0x18a   : > { %v1050_v26 = vpop.f32.mrf.mxu0  ;;  %v1066_v27 = vpop.f32.mrf.mxu1 }
 0x18b   : > { %857 = vst [vmem:[%s1395_s11 + $0x28] sm:$0xff] %v745_v24  ;;  %873 = vst [vmem:[%s1395_s11 + $0xa8] sm:$0xff] %v809_v25  ;;  %v766_v29 = vadd.f32 %v1050_v26, %v1379_v40  ;;  %v830_v30 = vadd.f32 %v1066_v27, %v535_v14  ;;  %v560_v56 = vpop.permute.xlu0 %559 }
 0x18c   : > { %v757_v31 = vpop.f32.mrf.mxu0  ;;  %v821_v32 = vpop.f32.mrf.mxu1 }
 0x18d   : > { %862 = vst [vmem:[%s1395_s11 + $0x50] sm:$0xff] %v766_v29  ;;  %878 = vst [vmem:[%s1395_s11 + $0xd0] sm:$0xff] %v830_v30  ;;  %v758_v33 = vadd.f32 %v757_v31, %v1375_v38  ;;  %v822_v34 = vadd.f32 %v821_v32, %v525_v0 }
 0x18e   : > { %v1051_v35 = vpop.f32.mrf.mxu0  ;;  %v1067_v36 = vpop.f32.mrf.mxu1 }
 0x18f   : > { %860 = vst [vmem:[%s1395_s11 + $0x40] sm:$0xff] %v758_v33  ;;  %876 = vst [vmem:[%s1395_s11 + $0xc0] sm:$0xff] %v822_v34  ;;  %v769_v46 = vadd.f32 %v1051_v35, %v1381_v41  ;;  %v833_v40 = vadd.f32 %v1067_v36, %v540_v23 }
 0x190   : > { %v760_v47 = vpop.f32.mrf.mxu0  ;;  %v824_v48 = vpop.f32.mrf.mxu1 }
 0x191   : > { %863 = vst [vmem:[%s1395_s11 + $0x58] sm:$0xff] %v769_v46  ;;  %879 = vst [vmem:[%s1395_s11 + $0xd8] sm:$0xff] %v833_v40  ;;  %v761_v38 = vadd.f32 %v760_v47, %v1377_v39  ;;  %v825_v50 = vadd.f32 %v824_v48, %v530_v9 }
 0x192   : > { %v1054_v51 = vpop.f32.mrf.mxu0  ;;  %v1070_v52 = vpop.f32.mrf.mxu1 }
 0x193   : > { %861 = vst [vmem:[%s1395_s11 + $0x48] sm:$0xff] %v761_v38  ;;  %877 = vst [vmem:[%s1395_s11 + $0xc8] sm:$0xff] %v825_v50  ;;  %v782_v53 = vadd.f32 %v1054_v51, %v1387_v44  ;;  %v846_v41 = vadd.f32 %v1070_v52, %v555_v49 }
 0x194   : > { %v773_v54 = vpop.f32.mrf.mxu0  ;;  %v837_v55 = vpop.f32.mrf.mxu1 }
 0x195   : > { %866 = vst [vmem:[%s1395_s11 + $0x70] sm:$0xff] %v782_v53  ;;  %882 = vst [vmem:[%s1395_s11 + $0xf0] sm:$0xff] %v846_v41  ;;  %v774_v39 = vadd.f32 %v773_v54, %v1383_v42  ;;  %v838_v57 = vadd.f32 %v837_v55, %v545_v28 }
 0x196   : > { %v1055_v58 = vpop.f32.mrf.mxu0  ;;  %v1071_v59 = vpop.f32.mrf.mxu1 }
 0x197   : > { %864 = vst [vmem:[%s1395_s11 + $0x60] sm:$0xff] %v774_v39  ;;  %880 = vst [vmem:[%s1395_s11 + $0xe0] sm:$0xff] %v838_v57  ;;  %v785_v60 = vadd.f32 %v1055_v58, %v1389_v45  ;;  %v849_v44 = vadd.f32 %v1071_v59, %v560_v56 }
 0x198   : > { %v776_v61 = vpop.f32.mrf.mxu0  ;;  %v840_v62 = vpop.f32.mrf.mxu1 }
 0x199   : > { %867 = vst [vmem:[%s1395_s11 + $0x78] sm:$0xff] %v785_v60  ;;  %883 = vst [vmem:[%s1395_s11 + $0xf8] sm:$0xff] %v849_v44  ;;  %v777_v63 = vadd.f32 %v776_v61, %v1385_v43  ;;  %v841_v0 = vadd.f32 %v840_v62, %v550_v37 }
 0x19b   : > { %865 = vst [vmem:[%s1395_s11 + $0x68] sm:$0xff] %v777_v63  ;;  %881 = vst [vmem:[%s1395_s11 + $0xe8] sm:$0xff] %v841_v0 }
 0x19c PF: > { %s13_s14 = sadd.s32 1, %s1155_s14   ;;  %s1451_s12 = smov %s1151_s13 }
 0x19d   : > { %p10_p5 = scmp.ge.s32.totalorder %s13_s14, 4   ;;  %s1452_s13 = smov %s1454_s15 }
 0x19f   :  { %12 = sbr.rel (!%p10_p5) target bundleno = 2 (0x2), region = 62 }

</bundles_post_ra>
